<compile_context>
chip_gen: v7x
topology: tpu7x:2x2x1
jax: 0.10.0
libtpu: 0.0.40
codegen_flags: <defaults>
</compile_context>

<pallas_src>
import jax
import jax.numpy as jnp
from jax.experimental import pallas as pl
from jax.experimental.pallas import tpu as pltpu


def _round_up(x, m):
    return ((x + m - 1) // m) * m


def ffnn_kernel(x_ref, w1_ref, b1_ref, w2_ref, b2_ref, o_ref):
    # x_ref : (TB, E)  bf16   w1_ref: (E, H)  bf16   b1_ref: (1, H)  f32
    # w2_ref: (H, TV)  bf16   b2_ref: (1, TV) f32    o_ref : (TB, TV) out_dtype
    h = jnp.dot(x_ref[...], w1_ref[...],
                preferred_element_type=jnp.float32) + b1_ref[...]
    h = jnp.maximum(h, 0.0)                                    # ReLU in f32
    out = jnp.dot(h.astype(jnp.bfloat16), w2_ref[...],
                  preferred_element_type=jnp.float32) + b2_ref[...]
    o_ref[...] = out.astype(o_ref.dtype)


def _ffnn_small(x2d, w1, b1, w2, b2, out_dtype):
    # XLA-fused fallback with the same numerics as the kernel
    # (bf16 operands, f32 accumulation, out_dtype output).
    h = jnp.dot(x2d.astype(jnp.bfloat16), w1.astype(jnp.bfloat16),
                preferred_element_type=jnp.float32) + b1.astype(jnp.float32)
    h = jnp.maximum(h, 0.0)
    out = jnp.dot(h.astype(jnp.bfloat16), w2.astype(jnp.bfloat16),
                  preferred_element_type=jnp.float32) + b2.astype(jnp.float32)
    return out.astype(out_dtype)


def ffnn_forward(x, w1, b1, w2, b2, *, tb=1024, tv_max=512,
                 out_dtype=jnp.bfloat16, min_pallas_batch=129):
    """Forward pass of FFNN.

    x : (B, ...) -> flattened to (B, E) like nn.Flatten
    w1: (E, H), b1: (H,), w2: (H, V), b2: (V,)   (weights stored (in, out))
    Returns logits of shape (B, V) in `out_dtype` (default bfloat16).
    """
    B = x.shape[0]
    x2d = x.reshape(B, -1)
    if x2d.dtype != jnp.bfloat16:
        # Stream X in bf16: halves X DMA bytes vs f32 and matches MXU operands.
        x2d = x2d.astype(jnp.bfloat16)
    E = x2d.shape[1]
    H = w1.shape[1]
    V = w2.shape[1]

    # Tiny batches: single grid step; fixed Pallas launch/DMA overhead exceeds
    # the math, so use the XLA-fused path.
    if B < min_pallas_batch:
        return _ffnn_small(x2d, w1, b1, w2, b2, out_dtype)

    # Batch tile: large (up to tb=1024) and a multiple of 256; pad batch so the
    # grid divides evenly (padded rows sliced off at the end).
    TB = min(tb, _round_up(B, 256))
    Bp = _round_up(B, TB)
    if Bp != B:
        x2d = jnp.pad(x2d, ((0, Bp - B), (0, 0)))

    # V tile: full V when small (demo V=256 -> one lane-dense block); tile in
    # tv_max chunks for production vocabularies to bound resident VMEM.
    if V <= 2048:
        TV, Vp = V, V
    else:
        TV = tv_max
        Vp = _round_up(V, TV)

    # Weights in bf16 (halves weight DMA bytes, native MXU dtype); biases f32.
    w1_bf = w1.astype(jnp.bfloat16)
    w2_bf = w2.astype(jnp.bfloat16)
    b1_2d = b1.reshape(1, H).astype(jnp.float32)
    b2_2d = b2.reshape(1, V).astype(jnp.float32)
    if Vp != V:
        w2_bf = jnp.pad(w2_bf, ((0, 0), (0, Vp - V)))
        b2_2d = jnp.pad(b2_2d, ((0, 0), (0, Vp - V)))

    out_bytes = jnp.dtype(out_dtype).itemsize
    # Rough VMEM footprint: double-buffered streamed operands + resident weights.
    vmem_est = (2 * TB * E * 2 + 2 * TB * TV * out_bytes
                + 2 * (E * H * 2 + H * TV * 2 + H * 4 + TV * 4))
    compiler_kwargs = dict(dimension_semantics=("parallel", "parallel"))
    if vmem_est > 24 * 1024 * 1024:
        # Raise the scoped-VMEM default (16 MiB v5e / 32 MiB v6e & v7x) so
        # resident weights + large batch tiles don't force spills/re-DMA.
        compiler_kwargs["vmem_limit_bytes"] = min(int(vmem_est * 1.5),
                                                  112 * 1024 * 1024)

    out = pl.pallas_call(
        ffnn_kernel,
        out_shape=jax.ShapeDtypeStruct((Bp, Vp), out_dtype),
        grid=(Bp // TB, Vp // TV),
        in_specs=[
            pl.BlockSpec((TB, E), lambda i, j: (i, 0)),   # X: streamed per batch tile
            pl.BlockSpec((E, H), lambda i, j: (0, 0)),    # W1: VMEM-resident
            pl.BlockSpec((1, H), lambda i, j: (0, 0)),    # b1: VMEM-resident
            pl.BlockSpec((H, TV), lambda i, j: (0, j)),   # W2: resident / V-streamed
            pl.BlockSpec((1, TV), lambda i, j: (0, j)),   # b2: resident / V-streamed
        ],
        out_specs=pl.BlockSpec((TB, TV), lambda i, j: (i, j)),
        compiler_params=pltpu.CompilerParams(**compiler_kwargs),
    )(x2d, w1_bf, b1_2d, w2_bf, b2_2d)

    return out[:B, :V]


if __name__ == "__main__":
    # Shapes consistent with the module: vocab_size=256, embedding_size=32,
    # hidden_units=128. Flatten is identity for 2-D input.
    vocab_size = 256
    embedding_size = 32
    hidden_units = 128

    key = jax.random.PRNGKey(0)
    kx, kw1, kb1, kw2, kb2 = jax.random.split(key, 5)

    # nn.Linear-style uniform init, stored as (in_features, out_features).
    bound1 = 1.0 / jnp.sqrt(embedding_size)
    w1 = jax.random.uniform(kw1, (embedding_size, hidden_units),
                            minval=-bound1, maxval=bound1, dtype=jnp.float32)
    b1 = jax.random.uniform(kb1, (hidden_units,),
                            minval=-bound1, maxval=bound1, dtype=jnp.float32)
    bound2 = 1.0 / jnp.sqrt(hidden_units)
    w2 = jax.random.uniform(kw2, (hidden_units, vocab_size),
                            minval=-bound2, maxval=bound2, dtype=jnp.float32)
    b2 = jax.random.uniform(kb2, (vocab_size,),
                            minval=-bound2, maxval=bound2, dtype=jnp.float32)

    def ref_f32(x):
        return jnp.maximum(x @ w1 + b1, 0.0) @ w2 + b2

    def ref_bf16(x):
        h = jnp.dot(x.astype(jnp.bfloat16), w1.astype(jnp.bfloat16),
                    preferred_element_type=jnp.float32) + b1
        h = jnp.maximum(h, 0.0)
        return jnp.dot(h.astype(jnp.bfloat16), w2.astype(jnp.bfloat16),
                       preferred_element_type=jnp.float32) + b2

    # --- Pallas path (batch large enough that tiling pays) ------------------
    batch_big = 512
    x_big = jax.random.normal(kx, (batch_big, embedding_size), dtype=jnp.float32)
    logits_big = ffnn_forward(x_big, w1, b1, w2, b2)
    jax.block_until_ready(logits_big)
    assert logits_big.shape == (batch_big, vocab_size)
    out_f32 = logits_big.astype(jnp.float32)

    # Reference 1: same numerics as the kernel (bf16 operands/output, f32 acc).
    ref1 = ref_bf16(x_big).astype(jnp.bfloat16).astype(jnp.float32)
    assert jnp.allclose(out_f32, ref1, atol=2e-2, rtol=2e-2)

    # Reference 2: module's exact fp32 semantics; bf16 rounding with f32
    # accumulation keeps the error small at these contraction sizes.
    assert jnp.allclose(out_f32, ref_f32(x_big), atol=1e-1, rtol=5e-2)

    # --- Tiny-batch fallback (XLA-fused path) -------------------------------
    batch_small = 8
    x_small = jax.random.normal(kx, (batch_small, embedding_size),
                                dtype=jnp.float32)
    logits_small = ffnn_forward(x_small, w1, b1, w2, b2)
    jax.block_until_ready(logits_small)
    assert logits_small.shape == (batch_small, vocab_size)
    assert jnp.allclose(logits_small.astype(jnp.float32), ref_f32(x_small),
                        atol=1e-1, rtol=5e-2)

    print("KERNEL_OK")
</pallas_src>

<mosaic_0001>
module attributes {stable_mosaic.version = 11 : i64} {
  func.func @ffnn_kernel(%arg0: i32, %arg1: i32, %arg2: memref<512x32xbf16, #tpu.memory_space<vmem>>, %arg3: memref<32x128xbf16, #tpu.memory_space<vmem>>, %arg4: memref<1x128xf32, #tpu.memory_space<vmem>>, %arg5: memref<128x256xbf16, #tpu.memory_space<vmem>>, %arg6: memref<1x256xf32, #tpu.memory_space<vmem>>, %arg7: memref<512x256xbf16, #tpu.memory_space<vmem>>) attributes {dimension_semantics = [#tpu.dimension_semantics<parallel>, #tpu.dimension_semantics<parallel>], iteration_bounds = array<i64: 1, 1>, scalar_prefetch = 0 : i64, scratch_operands = 0 : i64, tpu.core_type = #tpu.core_type<tc>, window_params = [{transform_indices = @transform_0, window_bounds = array<i64: 512, 32>}, {pipeline_mode = #tpu.pipeline_mode<synchronous>, transform_indices = @transform_1, window_bounds = array<i64: 32, 128>}, {pipeline_mode = #tpu.pipeline_mode<synchronous>, transform_indices = @transform_2, window_bounds = array<i64: 1, 128>}, {transform_indices = @transform_3, window_bounds = array<i64: 128, 256>}, {transform_indices = @transform_4, window_bounds = array<i64: 1, 256>}, {transform_indices = @transform_5, window_bounds = array<i64: 512, 256>}]} {
    %c0 = arith.constant 0 : index
    %c0_0 = arith.constant 0 : index
    %0 = vector.load %arg2[%c0, %c0_0] : memref<512x32xbf16, #tpu.memory_space<vmem>>, vector<512x32xbf16>
    %c0_1 = arith.constant 0 : index
    %c0_2 = arith.constant 0 : index
    %1 = vector.load %arg3[%c0_1, %c0_2] : memref<32x128xbf16, #tpu.memory_space<vmem>>, vector<32x128xbf16>
    %cst = arith.constant dense<0.000000e+00> : vector<512x128xf32>
    %2 = tpu.matmul %0, %1, %cst {dimension_numbers = #tpu.dot_dimension_numbers<[1], [0], [0], [1], [0, 0, 1, 1], [], []>} : vector<512x32xbf16>, vector<32x128xbf16>, vector<512x128xf32> -> vector<512x128xf32>
    %c0_3 = arith.constant 0 : index
    %c0_4 = arith.constant 0 : index
    %3 = vector.load %arg4[%c0_3, %c0_4] : memref<1x128xf32, #tpu.memory_space<vmem>>, vector<1x128xf32>
    %4 = vector.broadcast %3 : vector<1x128xf32> to vector<512x128xf32>
    %5 = arith.addf %2, %4 : vector<512x128xf32>
    %cst_5 = arith.constant 0.000000e+00 : f32
    %6 = vector.broadcast %cst_5 : f32 to vector<512x128xf32>
    %7 = arith.maximumf %5, %6 : vector<512x128xf32>
    %8 = arith.truncf %7 : vector<512x128xf32> to vector<512x128xbf16>
    %c0_6 = arith.constant 0 : index
    %c0_7 = arith.constant 0 : index
    %9 = vector.load %arg5[%c0_6, %c0_7] : memref<128x256xbf16, #tpu.memory_space<vmem>>, vector<128x256xbf16>
    %cst_8 = arith.constant dense<0.000000e+00> : vector<512x256xf32>
    %10 = tpu.matmul %8, %9, %cst_8 {dimension_numbers = #tpu.dot_dimension_numbers<[1], [0], [0], [1], [0, 0, 1, 1], [], []>} : vector<512x128xbf16>, vector<128x256xbf16>, vector<512x256xf32> -> vector<512x256xf32>
    %c0_9 = arith.constant 0 : index
    %c0_10 = arith.constant 0 : index
    %11 = vector.load %arg6[%c0_9, %c0_10] : memref<1x256xf32, #tpu.memory_space<vmem>>, vector<1x256xf32>
    %12 = vector.broadcast %11 : vector<1x256xf32> to vector<512x256xf32>
    %13 = arith.addf %10, %12 : vector<512x256xf32>
    %14 = arith.truncf %13 : vector<512x256xf32> to vector<512x256xbf16>
    %c0_11 = arith.constant 0 : index
    %c0_12 = arith.constant 0 : index
    %15 = vector.load %arg7[%c0_11, %c0_12] : memref<512x256xbf16, #tpu.memory_space<vmem>>, vector<512x256xbf16>
    tpu.vector_store %arg7[%c0_11, %c0_12], %14 {strides = array<i32>} : memref<512x256xbf16, #tpu.memory_space<vmem>>, vector<512x256xbf16>,
    return
  }
  func.func @transform_0(%arg0: i32, %arg1: i32) -> (i32, i32) {
    %c0_i32 = arith.constant 0 : i32
    %c0_i32_0 = arith.constant 0 : i32
    return %arg0, %c0_i32 : i32, i32
  }
  func.func @transform_1(%arg0: i32, %arg1: i32) -> (i32, i32) {
    %c0_i32 = arith.constant 0 : i32
    %c0_i32_0 = arith.constant 0 : i32
    %c0_i32_1 = arith.constant 0 : i32
    return %c0_i32, %c0_i32_0 : i32, i32
  }
  func.func @transform_2(%arg0: i32, %arg1: i32) -> (i32, i32) {
    %c0_i32 = arith.constant 0 : i32
    %c0_i32_0 = arith.constant 0 : i32
    %c0_i32_1 = arith.constant 0 : i32
    return %c0_i32, %c0_i32_0 : i32, i32
  }
  func.func @transform_3(%arg0: i32, %arg1: i32) -> (i32, i32) {
    %c0_i32 = arith.constant 0 : i32
    %c0_i32_0 = arith.constant 0 : i32
    return %c0_i32, %arg1 : i32, i32
  }
  func.func @transform_4(%arg0: i32, %arg1: i32) -> (i32, i32) {
    %c0_i32 = arith.constant 0 : i32
    %c0_i32_0 = arith.constant 0 : i32
    return %c0_i32, %arg1 : i32, i32
  }
  func.func @transform_5(%arg0: i32, %arg1: i32) -> (i32, i32) {
    %c0_i32 = arith.constant 0 : i32
    return %arg0, %arg1 : i32, i32
  }
}

</mosaic_0001>

<bundles_post_ra>
// kernel: tpu_custom_call.1
= control target key start
LH: loop header
LB: loop body
LE: loop exit
PB: predicated region body
PF: predicated region fallthrough
CT: control target
= control target key end

     0   :  { %vm269_vm0 = vcmask 261120   ;;  %s2582_s0 = inlined_call_operand.vmem [shape: bf16[512,32], index: 0, kind: input, shape index: {}]   ;;  %s2583_s1 = inlined_call_operand.vmem [shape: bf16[32,128], index: 1, kind: input, shape index: {}]   ;;  %s2584_s2 = inlined_call_operand.vmem [shape: f32[1,128], index: 2, kind: input, shape index: {}]   ;;  %s2585_s3 = inlined_call_operand.vmem [shape: bf16[128,256], index: 3, kind: input, shape index: {}]   ;;  %s2586_s4 = inlined_call_operand.vmem [shape: f32[1,256], index: 4, kind: input, shape index: {}]   ;;  %s2587_s5 = inlined_call_operand.hbm [shape: bf16[512,256], index: 5, kind: output, shape index: {}]  }
   0x1   :  { %v2009_v0 = vld [vmem:[%s2583_s1] sm:$0xff]   ;;  %v2010_v1 = vld [vmem:[%s2583_s1 + $0x8] sm:$0xff]   ;;  %v2013_v4 = vld [vmem:[%s2582_s0 + $0x10] sm:$0xff]  }
   0x2   :  { %1921 = vmatprep.subr.bf16.mxu0 %v2009_v0  ;;  %v2011_v2 = vld [vmem:[%s2582_s0] sm:$0xff]   ;;  %v2012_v3 = vld [vmem:[%s2582_s0 + $0x8] sm:$0xff]   ;;  %v2014_v5 = vld [vmem:[%s2582_s0 + $0x18] sm:$0xff]  }
   0x3   :  { %1922 = vmatpush3.bf16.msra.mxu0 %v2009_v0  ;;  %1925 = vmatprep.mubr.msk.bf16.mxu0 %vm269_vm0, %v2011_v2  ;;  %v2015_v6 = vld [vmem:[%s2582_s0 + $0x20] sm:$0xff]   ;;  %v2016_v7 = vld [vmem:[%s2582_s0 + $0x28] sm:$0xff]   ;;  %v2017_v8 = vld [vmem:[%s2582_s0 + $0x30] sm:$0xff]  }
   0x4   :  { %1923 = vmatprep.subr.bf16.mxu0 %v2010_v1  ;;  %v2018_v9 = vld [vmem:[%s2582_s0 + $0x38] sm:$0xff]   ;;  %v2019_v10 = vld [vmem:[%s2582_s0 + $0x40] sm:$0xff]   ;;  %v2020_v16 = vld [vmem:[%s2582_s0 + $0x48] sm:$0xff]  }
   0x5   :  { %v2041_v11 = vld [vmem:[%s2585_s3] ss:$8 sps:$4 sm:$0xff]   ;;  %v2043_v12 = vld [vmem:[%s2585_s3 + $0x4] ss:$8 sps:$4 sm:$0xff]   ;;  %v2046_v13 = vld [vmem:[%s2585_s3 + $0x14] ss:$8 sps:$4 sm:$0xff]  }
   0x6   :  { %v2044_v14 = vld [vmem:[%s2585_s3 + $0x10] ss:$8 sps:$4 sm:$0xff]   ;;  %1989 = vmatprep.subr.bf16.mxu1 %v2043_v12  ;;  %v2051_v15 = vld [vmem:[%s2585_s3 + $0x24] ss:$8 sps:$4 sm:$0xff]   ;;  %v2049_v18 = vld [vmem:[%s2585_s3 + $0x20] ss:$8 sps:$4 sm:$0xff]  }
   0x7   :  { %1924 = vmatpush3.bf16.msra.mxu0 %v2010_v1  ;;  %1997 = vmatpush1.bf16.msra.mxu1 %v2041_v11  ;;  %v2021_v17 = vld [vmem:[%s2582_s0 + $0x50] sm:$0xff]  }
   0x8   :  { %859 = vmatprep.subr.bf16.mxu0 %v2043_v12  ;;  %1990 = vmatprep.subr.bf16.mxu1 %v2046_v13  ;;  %v2054_v19 = vld [vmem:[%s2585_s3 + $0x34] ss:$8 sps:$4 sm:$0xff]  }
   0xa   :  { %1926 = vmatmul.mubr.msk.bf16.vlgmr.msra.gmra.mrb[0].mxu0 %vm269_vm0, %v2012_v3 }
   0xb   :  { %1929 = vmatprep.mubr.msk.bf16.mxu0 %vm269_vm0, %v2013_v4  ;;  %860 = vmatpush1.bf16.msra.mxu0 %v2041_v11 }
   0xc   :  { %861 = vmatprep.subr.bf16.mxu0 %v2046_v13  ;;  %1998 = vmatpush1.bf16.msra.mxu1 %v2044_v14 }
   0xd   :  { %1991 = vmatprep.subr.bf16.mxu1 %v2051_v15 }
   0xf   :  { %862 = vmatpush1.bf16.msra.mxu0 %v2044_v14 }
  0x10   :  { %863 = vmatprep.subr.bf16.mxu0 %v2051_v15 }
  0x12   :  { %1930 = vmatmul.mubr.msk.bf16.gmra.mrb[4].mxu0 %vm269_vm0, %v2014_v5 }
  0x13   :  { %1933 = vmatprep.mubr.msk.bf16.mxu0 %vm269_vm0, %v2015_v6 }
  0x1a   :  { %1934 = vmatmul.mubr.msk.bf16.gmra.mrb[8].mxu0 %vm269_vm0, %v2016_v7 }
  0x1b   :  { %1937 = vmatprep.mubr.msk.bf16.mxu0 %vm269_vm0, %v2017_v8 }
  0x22   :  { %1938 = vmatmul.mubr.msk.bf16.gmra.mrb[12].mxu0 %vm269_vm0, %v2018_v9 }
  0x23   :  { %1941 = vmatprep.mubr.msk.bf16.mxu0 %vm269_vm0, %v2019_v10 }
  0x2a   :  { %1942 = vmatmul.mubr.msk.bf16.gmra.mrb[16].mxu0 %vm269_vm0, %v2020_v16 }
  0x2b   :  { %1945 = vmatprep.mubr.msk.bf16.mxu0 %vm269_vm0, %v2021_v17 }
  0x2c   :  { %10 = vsyncpa [#allocation3], 0  ;;  %864 = vmatpush1.bf16.msra.mxu0 %v2049_v18  ;;  %v2052_v20 = vld [vmem:[%s2585_s3 + $0x30] ss:$8 sps:$4 sm:$0xff]   ;;  %v2057_v21 = vld [vmem:[%s2585_s3 + $0x44] ss:$8 sps:$4 sm:$0xff]   ;;  %1999 = vmatpush1.bf16.msra.mxu1 %v2049_v18 }
  0x2d   :  { %865 = vmatprep.subr.bf16.mxu0 %v2054_v19  ;;  %v2022_v22 = vld [vmem:[%s2582_s0 + $0x58] sm:$0xff]   ;;  %1992 = vmatprep.subr.bf16.mxu1 %v2054_v19  ;;  %v2023_v23 = vld [vmem:[%s2582_s0 + $0x60] sm:$0xff]   ;;  %v2024_v27 = vld [vmem:[%s2582_s0 + $0x68] sm:$0xff]   ;;  %v2091_v44 = vmov 0  }
  0x2e   :  { %v2055_v24 = vld [vmem:[%s2585_s3 + $0x40] ss:$8 sps:$4 sm:$0xff]   ;;  %v2060_v25 = vld [vmem:[%s2585_s3 + $0x54] ss:$8 sps:$4 sm:$0xff]   ;;  %v2058_v26 = vld [vmem:[%s2585_s3 + $0x50] ss:$8 sps:$4 sm:$0xff]   ;;  %981 = vmatprep.mubr.bf16.mxu1 %v2091_v44 }
  0x2f   :  { %v2025_v28 = vld [vmem:[%s2582_s0 + $0x70] sm:$0xff]   ;;  %v2026_v29 = vld [vmem:[%s2582_s0 + $0x78] sm:$0xff]   ;;  %v2027_v30 = vld [vmem:[%s2582_s0 + $0x80] sm:$0xff]  }
  0x30   :  { %866 = vmatpush1.bf16.msra.mxu0 %v2052_v20  ;;  %2000 = vmatpush1.bf16.msra.mxu1 %v2052_v20  ;;  %v2028_v31 = vld [vmem:[%s2582_s0 + $0x88] sm:$0xff]   ;;  %v2029_v32 = vld [vmem:[%s2582_s0 + $0x90] sm:$0xff]   ;;  %v2030_v33 = vld [vmem:[%s2582_s0 + $0x98] sm:$0xff]  }
  0x31   :  { %867 = vmatprep.subr.bf16.mxu0 %v2057_v21  ;;  %1993 = vmatprep.subr.bf16.mxu1 %v2057_v21  ;;  %v2031_v34 = vld [vmem:[%s2582_s0 + $0xa0] sm:$0xff]   ;;  %v2032_v35 = vld [vmem:[%s2582_s0 + $0xa8] sm:$0xff]   ;;  %v2033_v36 = vld [vmem:[%s2582_s0 + $0xb0] sm:$0xff]  }
  0x32   :  { %1946 = vmatmul.mubr.msk.bf16.gmra.mrb[20].mxu0 %vm269_vm0, %v2022_v22  ;;  %v2063_v37 = vld [vmem:[%s2585_s3 + $0x64] ss:$8 sps:$4 sm:$0xff]   ;;  %v2034_v38 = vld [vmem:[%s2582_s0 + $0xb8] sm:$0xff]   ;;  %v2061_v39 = vld [vmem:[%s2585_s3 + $0x60] ss:$8 sps:$4 sm:$0xff]  }
  0x33   :  { %1949 = vmatprep.mubr.msk.bf16.mxu0 %vm269_vm0, %v2023_v23  ;;  %v2035_v40 = vld [vmem:[%s2582_s0 + $0xc0] sm:$0xff]   ;;  %v2066_v41 = vld [vmem:[%s2585_s3 + $0x74] ss:$8 sps:$4 sm:$0xff]   ;;  %v2064_v42 = vld [vmem:[%s2585_s3 + $0x70] ss:$8 sps:$4 sm:$0xff]  }
  0x34   :  { %868 = vmatpush1.bf16.msra.mxu0 %v2055_v24  ;;  %2001 = vmatpush1.bf16.msra.mxu1 %v2055_v24  ;;  %v2036_v43 = vld [vmem:[%s2582_s0 + $0xc8] sm:$0xff]   ;;  %v2037_v45 = vld [vmem:[%s2582_s0 + $0xd0] sm:$0xff]   ;;  %v2038_v46 = vld [vmem:[%s2582_s0 + $0xd8] sm:$0xff]  }
  0x35   :  { %869 = vmatprep.subr.bf16.mxu0 %v2060_v25  ;;  %1994 = vmatprep.subr.bf16.mxu1 %v2060_v25  ;;  %v2039_v47 = vld [vmem:[%s2582_s0 + $0xe0] sm:$0xff]   ;;  %v2040_v48 = vld [vmem:[%s2582_s0 + $0xe8] sm:$0xff]   ;;  %v2047_v49 = vld [vmem:[%s2582_s0 + $0xf0] sm:$0xff]  }
  0x36   :  { %v2048_v50 = vld [vmem:[%s2582_s0 + $0xf8] sm:$0xff]   ;;  %v2312_v51 = vld [vmem:[%s2584_s2] ss:$0 sm:$0xff] }
  0x38   :  { %870 = vmatpush1.bf16.msra.mxu0 %v2058_v26  ;;  %2002 = vmatpush1.bf16.msra.mxu1 %v2058_v26 }
  0x39   :  { %871 = vmatprep.subr.bf16.mxu0 %v2063_v37  ;;  %1995 = vmatprep.subr.bf16.mxu1 %v2063_v37 }
  0x3a   :  { %1950 = vmatmul.mubr.msk.bf16.gmra.mrb[24].mxu0 %vm269_vm0, %v2024_v27 }
  0x3b   :  { %1953 = vmatprep.mubr.msk.bf16.mxu0 %vm269_vm0, %v2025_v28 }
  0x3c   :  { %872 = vmatpush1.bf16.msra.mxu0 %v2061_v39  ;;  %2003 = vmatpush1.bf16.msra.mxu1 %v2061_v39 }
  0x3d   :  { %873 = vmatprep.subr.bf16.mxu0 %v2066_v41  ;;  %1996 = vmatprep.subr.bf16.mxu1 %v2066_v41 }
  0x40   :  { %874 = vmatpush1.bf16.msra.mxu0 %v2064_v42  ;;  %2004 = vmatpush1.bf16.msra.mxu1 %v2064_v42 }
  0x42   :  { %1954 = vmatmul.mubr.msk.bf16.gmra.mrb[28].mxu0 %vm269_vm0, %v2026_v29 }
  0x43   :  { %1957 = vmatprep.mubr.msk.bf16.mxu0 %vm269_vm0, %v2027_v30 }
  0x4a   :  { %1958 = vmatmul.mubr.msk.bf16.gmra.mrb[32].mxu0 %vm269_vm0, %v2028_v31 }
  0x4b   :  { %1961 = vmatprep.mubr.msk.bf16.mxu0 %vm269_vm0, %v2029_v32 }
  0x52   :  { %1962 = vmatmul.mubr.msk.bf16.gmra.mrb[36].mxu0 %vm269_vm0, %v2030_v33 }
  0x53   :  { %1965 = vmatprep.mubr.msk.bf16.mxu0 %vm269_vm0, %v2031_v34 }
  0x5a   :  { %1966 = vmatmul.mubr.msk.bf16.gmra.mrb[40].mxu0 %vm269_vm0, %v2032_v35 }
  0x5b   :  { %1969 = vmatprep.mubr.msk.bf16.mxu0 %vm269_vm0, %v2033_v36 }
  0x62   :  { %1970 = vmatmul.mubr.msk.bf16.gmra.mrb[44].mxu0 %vm269_vm0, %v2034_v38 }
  0x63   :  { %1973 = vmatprep.mubr.msk.bf16.mxu0 %vm269_vm0, %v2035_v40 }
  0x6a   :  { %1974 = vmatmul.mubr.msk.bf16.gmra.mrb[48].mxu0 %vm269_vm0, %v2036_v43 }
  0x6b   :  { %1977 = vmatprep.mubr.msk.bf16.mxu0 %vm269_vm0, %v2037_v45 }
  0x72   :  { %1978 = vmatmul.mubr.msk.bf16.gmra.mrb[52].mxu0 %vm269_vm0, %v2038_v46 }
  0x73   :  { %1981 = vmatprep.mubr.msk.bf16.mxu0 %vm269_vm0, %v2039_v47 }
  0x7a   :  { %1982 = vmatmul.mubr.msk.bf16.gmra.mrb[56].mxu0 %vm269_vm0, %v2040_v48 }
  0x7b   :  { %1985 = vmatprep.mubr.msk.bf16.mxu0 %vm269_vm0, %v2047_v49 }
  0x82   :  { %1986 = vmatmul.mubr.msk.bf16.gmra.mrb[60].mxu0 %vm269_vm0, %v2048_v50 }
  0x83   :  { %891 = vmatprep.mubr.bf16.mxu0 %v2091_v44 }
  0xdd   :  { %v1927_v52 = vpop.f32.mrb[0].mxu0 }
  0xde   :  { %v409_v53 = vadd.f32 %v1927_v52, %v2312_v51  ;;  %v400_v54 = vpop.f32.mrb[1].mxu0 }
  0xdf   :  { %v401_v55 = vadd.f32 %v2312_v51, %v400_v54  ;;  %v1928_v56 = vpop.f32.mrb[2].mxu0 }
  0xe0   :  { %v412_v57 = vadd.f32 %v1928_v56, %v2312_v51  ;;  %v403_v58 = vpop.f32.mrb[3].mxu0  ;;  %v657_v60 = vmax.f32 %v409_v53, 0.0 }
  0xe1   :  { %v404_v59 = vadd.f32 %v2312_v51, %v403_v58  ;;  %v655_v62 = vmax.f32 %v401_v55, 0.0 }
  0xe2   :  { %v658_v61 = vmax.f32 %v412_v57, 0.0 }
  0xe3   :  { %v656_v63 = vmax.f32 %v404_v59, 0.0 }
  0xe4   :  { %v720_v0 = vpack.c.bf16 %v658_v61, %v657_v60 }
  0xe5   :  { %v719_v1 = vpack.c.bf16 %v656_v63, %v655_v62  ;;  %v1931_v2 = vpop.f32.mrb[4].mxu0 }
  0xe6   :  { %v425_v3 = vadd.f32 %v1931_v2, %v2312_v51  ;;  %v416_v4 = vpop.f32.mrb[5].mxu0 }
  0xe7   :  { %v417_v5 = vadd.f32 %v2312_v51, %v416_v4  ;;  %v1932_v6 = vpop.f32.mrb[6].mxu0  ;;  %892 = vmatmul.mubr.bf16.vlgmr.msra.gmra.mrb[64].mxu0 %v719_v1 }
  0xe8   :  { %v428_v7 = vadd.f32 %v1932_v6, %v2312_v51  ;;  %v419_v8 = vpop.f32.mrb[7].mxu0  ;;  %901 = vmatprep.mubr.bf16.mxu0 %v2091_v44  ;;  %v661_v10 = vmax.f32 %v425_v3, 0.0 }
  0xe9   :  { %v420_v9 = vadd.f32 %v2312_v51, %v419_v8  ;;  %v659_v12 = vmax.f32 %v417_v5, 0.0 }
  0xea   :  { %v662_v11 = vmax.f32 %v428_v7, 0.0 }
  0xeb   :  { %v660_v13 = vmax.f32 %v420_v9, 0.0 }
  0xec   :  { %v722_v14 = vpack.c.bf16 %v662_v11, %v661_v10 }
  0xed   :  { %v721_v15 = vpack.c.bf16 %v660_v13, %v659_v12  ;;  %v1935_v16 = vpop.f32.mrb[8].mxu0 }
  0xee   :  { %v441_v17 = vadd.f32 %v1935_v16, %v2312_v51  ;;  %v432_v18 = vpop.f32.mrb[9].mxu0 }
  0xef   :  { %v433_v19 = vadd.f32 %v2312_v51, %v432_v18  ;;  %v1936_v20 = vpop.f32.mrb[10].mxu0  ;;  %902 = vmatmul.mubr.bf16.gmra.mrb[68].mxu0 %v720_v0 }
  0xf0   :  { %v444_v21 = vadd.f32 %v1936_v20, %v2312_v51  ;;  %v435_v22 = vpop.f32.mrb[11].mxu0  ;;  %911 = vmatprep.mubr.bf16.mxu0 %v2091_v44  ;;  %v665_v24 = vmax.f32 %v441_v17, 0.0 }
  0xf1   :  { %v436_v23 = vadd.f32 %v2312_v51, %v435_v22  ;;  %v663_v26 = vmax.f32 %v433_v19, 0.0 }
  0xf2   :  { %v666_v25 = vmax.f32 %v444_v21, 0.0 }
  0xf3   :  { %v664_v27 = vmax.f32 %v436_v23, 0.0 }
  0xf4   :  { %v724_v28 = vpack.c.bf16 %v666_v25, %v665_v24 }
  0xf5   :  { %v723_v29 = vpack.c.bf16 %v664_v27, %v663_v26  ;;  %v1939_v30 = vpop.f32.mrb[12].mxu0 }
  0xf6   :  { %v457_v31 = vadd.f32 %v1939_v30, %v2312_v51  ;;  %v448_v32 = vpop.f32.mrb[13].mxu0 }
  0xf7   :  { %v449_v33 = vadd.f32 %v2312_v51, %v448_v32  ;;  %v1940_v34 = vpop.f32.mrb[14].mxu0  ;;  %912 = vmatmul.mubr.bf16.gmra.mrb[72].mxu0 %v721_v15 }
  0xf8   :  { %v460_v35 = vadd.f32 %v1940_v34, %v2312_v51  ;;  %v451_v36 = vpop.f32.mrb[15].mxu0  ;;  %921 = vmatprep.mubr.bf16.mxu0 %v2091_v44  ;;  %v669_v38 = vmax.f32 %v457_v31, 0.0 }
  0xf9   :  { %v452_v37 = vadd.f32 %v2312_v51, %v451_v36  ;;  %v667_v40 = vmax.f32 %v449_v33, 0.0 }
  0xfa   :  { %v670_v39 = vmax.f32 %v460_v35, 0.0 }
  0xfb   :  { %v668_v41 = vmax.f32 %v452_v37, 0.0 }
  0xfc   :  { %v2333_v42 = vpack.c.bf16 %v670_v39, %v669_v38 }
  0xfd   :  { %v725_v43 = vpack.c.bf16 %v668_v41, %v667_v40  ;;  %v1943_v45 = vpop.f32.mrb[16].mxu0 }
  0xfe   :  { %v473_v46 = vadd.f32 %v1943_v45, %v2312_v51  ;;  %v464_v47 = vpop.f32.mrb[17].mxu0 }
  0xff   :  { %v465_v48 = vadd.f32 %v2312_v51, %v464_v47  ;;  %v1944_v49 = vpop.f32.mrb[18].mxu0  ;;  %922 = vmatmul.mubr.bf16.gmra.mrb[76].mxu0 %v722_v14 }
 0x100   :  { %v476_v50 = vadd.f32 %v1944_v49, %v2312_v51  ;;  %v467_v52 = vpop.f32.mrb[19].mxu0  ;;  %931 = vmatprep.mubr.bf16.mxu0 %v2091_v44  ;;  %v673_v54 = vmax.f32 %v473_v46, 0.0 }
 0x101   :  { %v468_v53 = vadd.f32 %v2312_v51, %v467_v52  ;;  %v671_v56 = vmax.f32 %v465_v48, 0.0 }
 0x102   :  { %v674_v55 = vmax.f32 %v476_v50, 0.0 }
 0x103   :  { %v672_v57 = vmax.f32 %v468_v53, 0.0 }
 0x104   :  { %v728_v58 = vpack.c.bf16 %v674_v55, %v673_v54 }
 0x105   :  { %v2340_v59 = vpack.c.bf16 %v672_v57, %v671_v56  ;;  %v1947_v60 = vpop.f32.mrb[20].mxu0 }
 0x106   :  { %v489_v61 = vadd.f32 %v1947_v60, %v2312_v51  ;;  %v480_v62 = vpop.f32.mrb[21].mxu0  ;;  %982 = vmatmul.mubr.bf16.vlgmr.msra.gmra.mrb[0].mxu1 %v728_v58 }
 0x107   :  { %v481_v63 = vadd.f32 %v2312_v51, %v480_v62  ;;  %v1948_v0 = vpop.f32.mrb[22].mxu0  ;;  %932 = vmatmul.mubr.bf16.gmra.mrb[80].mxu0 %v723_v29  ;;  %991 = vmatprep.mubr.bf16.mxu1 %v2091_v44 }
 0x108   :  { %v492_v1 = vadd.f32 %v1948_v0, %v2312_v51  ;;  %v483_v2 = vpop.f32.mrb[23].mxu0  ;;  %941 = vmatprep.mubr.bf16.mxu0 %v2091_v44  ;;  %v677_v4 = vmax.f32 %v489_v61, 0.0 }
 0x109   :  { %v484_v3 = vadd.f32 %v2312_v51, %v483_v2  ;;  %v675_v6 = vmax.f32 %v481_v63, 0.0 }
 0x10a   :  { %v678_v5 = vmax.f32 %v492_v1, 0.0 }
 0x10b   :  { %v676_v7 = vmax.f32 %v484_v3, 0.0 }
 0x10c   :  { %v730_v8 = vpack.c.bf16 %v678_v5, %v677_v4 }
 0x10d   :  { %v729_v9 = vpack.c.bf16 %v676_v7, %v675_v6  ;;  %v1951_v10 = vpop.f32.mrb[24].mxu0 }
 0x10e   :  { %v505_v11 = vadd.f32 %v1951_v10, %v2312_v51  ;;  %v496_v12 = vpop.f32.mrb[25].mxu0 }
 0x10f   :  { %942 = vmatmul.mubr.bf16.gmra.mrb[84].mxu0 %v724_v28  ;;  %992 = vmatmul.mubr.bf16.gmra.mrb[4].mxu1 %v729_v9  ;;  %v497_v13 = vadd.f32 %v2312_v51, %v496_v12  ;;  %v1952_v14 = vpop.f32.mrb[26].mxu0 }
 0x110   :  { %v681_v15 = vmax.f32 %v505_v11, 0.0  ;;  %v508_v16 = vadd.f32 %v1952_v14, %v2312_v51  ;;  %v499_v17 = vpop.f32.mrb[27].mxu0  ;;  %951 = vmatprep.mubr.bf16.mxu0 %v2091_v44  ;;  %1001 = vmatprep.mubr.bf16.mxu1 %v2091_v44 }
 0x111   :  { %v679_v18 = vmax.f32 %v497_v13, 0.0  ;;  %v500_v19 = vadd.f32 %v2312_v51, %v499_v17 }
 0x112   :  { %v682_v20 = vmax.f32 %v508_v16, 0.0 }
 0x113   :  { %v680_v21 = vmax.f32 %v500_v19, 0.0 }
 0x114   :  { %v732_v22 = vpack.c.bf16 %v682_v20, %v681_v15 }
 0x115   :  { %v731_v23 = vpack.c.bf16 %v680_v21, %v679_v18  ;;  %v1955_v24 = vpop.f32.mrb[28].mxu0 }
 0x116   :  { %v521_v25 = vadd.f32 %v1955_v24, %v2312_v51  ;;  %v512_v26 = vpop.f32.mrb[29].mxu0 }
 0x117   :  { %952 = vmatmul.mubr.bf16.gmra.mrb[88].mxu0 %v725_v43  ;;  %1002 = vmatmul.mubr.bf16.gmra.mrb[8].mxu1 %v730_v8  ;;  %v513_v27 = vadd.f32 %v2312_v51, %v512_v26  ;;  %v1956_v28 = vpop.f32.mrb[30].mxu0 }
 0x118   :  { %961 = vmatprep.mubr.bf16.mxu0 %v2091_v44  ;;  %1011 = vmatprep.mubr.bf16.mxu1 %v2091_v44  ;;  %v685_v29 = vmax.f32 %v521_v25, 0.0  ;;  %v524_v30 = vadd.f32 %v1956_v28, %v2312_v51  ;;  %v515_v31 = vpop.f32.mrb[31].mxu0 }
 0x119   :  { %v683_v32 = vmax.f32 %v513_v27, 0.0  ;;  %v516_v33 = vadd.f32 %v2312_v51, %v515_v31 }
 0x11a   :  { %v686_v34 = vmax.f32 %v524_v30, 0.0 }
 0x11b   :  { %v684_v35 = vmax.f32 %v516_v33, 0.0 }
 0x11c   :  { %v734_v36 = vpack.c.bf16 %v686_v34, %v685_v29 }
 0x11d   :  { %v733_v37 = vpack.c.bf16 %v684_v35, %v683_v32  ;;  %v1959_v38 = vpop.f32.mrb[32].mxu0 }
 0x11e   :  { %v537_v39 = vadd.f32 %v1959_v38, %v2312_v51  ;;  %v528_v40 = vpop.f32.mrb[33].mxu0 }
 0x11f   :  { %962 = vmatmul.mubr.bf16.gmra.mrb[92].mxu0 %v2333_v42  ;;  %1012 = vmatmul.mubr.bf16.gmra.mrb[12].mxu1 %v731_v23  ;;  %v529_v41 = vadd.f32 %v2312_v51, %v528_v40  ;;  %v1960_v43 = vpop.f32.mrb[34].mxu0 }
 0x120   :  { %971 = vmatprep.mubr.bf16.mxu0 %v2091_v44  ;;  %1021 = vmatprep.mubr.bf16.mxu1 %v2091_v44  ;;  %v689_v45 = vmax.f32 %v537_v39, 0.0  ;;  %v540_v46 = vadd.f32 %v1960_v43, %v2312_v51  ;;  %v531_v47 = vpop.f32.mrb[35].mxu0 }
 0x121   :  { %v687_v48 = vmax.f32 %v529_v41, 0.0  ;;  %v532_v49 = vadd.f32 %v2312_v51, %v531_v47 }
 0x122   :  { %v690_v50 = vmax.f32 %v540_v46, 0.0 }
 0x123   :  { %v688_v52 = vmax.f32 %v532_v49, 0.0 }
 0x124   :  { %v2367_v53 = vpack.c.bf16 %v690_v50, %v689_v45 }
 0x125   :  { %v735_v42 = vpack.c.bf16 %v688_v52, %v687_v48  ;;  %v1963_v54 = vpop.f32.mrb[36].mxu0 }
 0x126   :  { %v553_v55 = vadd.f32 %v1963_v54, %v2312_v51  ;;  %v544_v56 = vpop.f32.mrb[37].mxu0 }
 0x127   :  { %972 = vmatmul.mubr.bf16.gmra.mrb[96].mxu0 %v2340_v59  ;;  %1022 = vmatmul.mubr.bf16.gmra.mrb[16].mxu1 %v732_v22  ;;  %v545_v57 = vadd.f32 %v2312_v51, %v544_v56  ;;  %v1964_v58 = vpop.f32.mrb[38].mxu0 }
 0x128   :  { %1031 = vmatprep.mubr.bf16.mxu1 %v2091_v44  ;;  %v693_v60 = vmax.f32 %v553_v55, 0.0  ;;  %v556_v61 = vadd.f32 %v1964_v58, %v2312_v51  ;;  %v547_v62 = vpop.f32.mrb[39].mxu0 }
 0x129   :  { %v691_v63 = vmax.f32 %v545_v57, 0.0  ;;  %v548_v0 = vadd.f32 %v2312_v51, %v547_v62 }
 0x12a   :  { %v694_v1 = vmax.f32 %v556_v61, 0.0 }
 0x12b   :  { %v692_v2 = vmax.f32 %v548_v0, 0.0 }
 0x12c   :  { %v2375_v3 = vpack.c.bf16 %v694_v1, %v693_v60 }
 0x12d   :  { %v2377_v4 = vpack.c.bf16 %v692_v2, %v691_v63  ;;  %v1967_v59 = vpop.f32.mrb[40].mxu0 }
 0x12e   :  { %v569_v5 = vadd.f32 %v1967_v59, %v2312_v51  ;;  %v560_v6 = vpop.f32.mrb[41].mxu0 }
 0x12f   :  { %1032 = vmatmul.mubr.bf16.gmra.mrb[20].mxu1 %v733_v37  ;;  %v561_v7 = vadd.f32 %v2312_v51, %v560_v6  ;;  %v1968_v8 = vpop.f32.mrb[42].mxu0 }
 0x130   :  { %1041 = vmatprep.mubr.bf16.mxu1 %v2091_v44  ;;  %v697_v9 = vmax.f32 %v569_v5, 0.0  ;;  %v572_v10 = vadd.f32 %v1968_v8, %v2312_v51  ;;  %v563_v11 = vpop.f32.mrb[43].mxu0 }
 0x131   :  { %v695_v12 = vmax.f32 %v561_v7, 0.0  ;;  %v564_v13 = vadd.f32 %v2312_v51, %v563_v11 }
 0x132   :  { %v698_v14 = vmax.f32 %v572_v10, 0.0 }
 0x133   :  { %v696_v15 = vmax.f32 %v564_v13, 0.0 }
 0x134   :  { %v2384_v16 = vpack.c.bf16 %v698_v14, %v697_v9 }
 0x135   :  { %v2386_v17 = vpack.c.bf16 %v696_v15, %v695_v12  ;;  %v1971_v18 = vpop.f32.mrb[44].mxu0 }
 0x136   :  { %v585_v19 = vadd.f32 %v1971_v18, %v2312_v51  ;;  %v576_v20 = vpop.f32.mrb[45].mxu0 }
 0x137   :  { %1042 = vmatmul.mubr.bf16.gmra.mrb[24].mxu1 %v734_v36  ;;  %v577_v21 = vadd.f32 %v2312_v51, %v576_v20  ;;  %v1972_v22 = vpop.f32.mrb[46].mxu0 }
 0x138   :  { %1051 = vmatprep.mubr.bf16.mxu1 %v2091_v44  ;;  %v701_v23 = vmax.f32 %v585_v19, 0.0  ;;  %v588_v24 = vadd.f32 %v1972_v22, %v2312_v51  ;;  %v579_v25 = vpop.f32.mrb[47].mxu0 }
 0x139   :  { %v699_v26 = vmax.f32 %v577_v21, 0.0  ;;  %v580_v27 = vadd.f32 %v2312_v51, %v579_v25 }
 0x13a   :  { %v702_v28 = vmax.f32 %v588_v24, 0.0 }
 0x13b   :  { %v700_v29 = vmax.f32 %v580_v27, 0.0 }
 0x13c   :  { %v2393_v30 = vpack.c.bf16 %v702_v28, %v701_v23 }
 0x13d   :  { %v2395_v31 = vpack.c.bf16 %v700_v29, %v699_v26  ;;  %v1975_v32 = vpop.f32.mrb[48].mxu0 }
 0x13e   :  { %v601_v33 = vadd.f32 %v1975_v32, %v2312_v51  ;;  %v592_v34 = vpop.f32.mrb[49].mxu0 }
 0x13f   :  { %1052 = vmatmul.mubr.bf16.gmra.mrb[28].mxu1 %v735_v42  ;;  %v593_v35 = vadd.f32 %v2312_v51, %v592_v34  ;;  %v1976_v36 = vpop.f32.mrb[50].mxu0 }
 0x140   :  { %1061 = vmatprep.mubr.bf16.mxu1 %v2091_v44  ;;  %v705_v37 = vmax.f32 %v601_v33, 0.0  ;;  %v604_v38 = vadd.f32 %v1976_v36, %v2312_v51  ;;  %v595_v39 = vpop.f32.mrb[51].mxu0 }
 0x141   :  { %v703_v40 = vmax.f32 %v593_v35, 0.0  ;;  %v596_v41 = vadd.f32 %v2312_v51, %v595_v39 }
 0x142   :  { %v706_v43 = vmax.f32 %v604_v38, 0.0 }
 0x143   :  { %v704_v45 = vmax.f32 %v596_v41, 0.0 }
 0x144   :  { %v744_v46 = vpack.c.bf16 %v706_v43, %v705_v37 }
 0x145   :  { %v743_v47 = vpack.c.bf16 %v704_v45, %v703_v40  ;;  %v1979_v48 = vpop.f32.mrb[52].mxu0 }
 0x146   :  { %v617_v49 = vadd.f32 %v1979_v48, %v2312_v51  ;;  %v608_v50 = vpop.f32.mrb[53].mxu0 }
 0x147   :  { %1062 = vmatmul.mubr.bf16.gmra.mrb[32].mxu1 %v2367_v53  ;;  %v609_v52 = vadd.f32 %v2312_v51, %v608_v50  ;;  %v1980_v42 = vpop.f32.mrb[54].mxu0 }
 0x148   :  { %1071 = vmatprep.mubr.bf16.mxu1 %v2091_v44  ;;  %v709_v54 = vmax.f32 %v617_v49, 0.0  ;;  %v620_v55 = vadd.f32 %v1980_v42, %v2312_v51  ;;  %v611_v56 = vpop.f32.mrb[55].mxu0 }
 0x149   :  { %v707_v57 = vmax.f32 %v609_v52, 0.0  ;;  %v612_v58 = vadd.f32 %v2312_v51, %v611_v56 }
 0x14a   :  { %v710_v60 = vmax.f32 %v620_v55, 0.0 }
 0x14b   :  { %v708_v61 = vmax.f32 %v612_v58, 0.0 }
 0x14c   :  { %v746_v62 = vpack.c.bf16 %v710_v60, %v709_v54 }
 0x14d   :  { %v745_v63 = vpack.c.bf16 %v708_v61, %v707_v57  ;;  %v1983_v0 = vpop.f32.mrb[56].mxu0 }
 0x14e   :  { %v633_v1 = vadd.f32 %v1983_v0, %v2312_v51  ;;  %v624_v53 = vpop.f32.mrb[57].mxu0 }
 0x14f   :  { %1072 = vmatmul.mubr.bf16.gmra.mrb[36].mxu1 %v2377_v4  ;;  %v625_v2 = vadd.f32 %v2312_v51, %v624_v53  ;;  %v1984_v59 = vpop.f32.mrb[58].mxu0 }
 0x150   :  { %1081 = vmatprep.mubr.bf16.mxu1 %v2091_v44  ;;  %v713_v5 = vmax.f32 %v633_v1, 0.0  ;;  %v636_v6 = vadd.f32 %v1984_v59, %v2312_v51  ;;  %v627_v7 = vpop.f32.mrb[59].mxu0 }
 0x151   :  { %v711_v8 = vmax.f32 %v625_v2, 0.0  ;;  %v628_v9 = vadd.f32 %v2312_v51, %v627_v7 }
 0x152   :  { %v714_v10 = vmax.f32 %v636_v6, 0.0 }
 0x153   :  { %v712_v11 = vmax.f32 %v628_v9, 0.0 }
 0x154   :  { %v748_v12 = vpack.c.bf16 %v714_v10, %v713_v5 }
 0x155   :  { %v747_v13 = vpack.c.bf16 %v712_v11, %v711_v8  ;;  %v1987_v14 = vpop.f32.mrb[60].mxu0 }
 0x156   :  { %v649_v15 = vadd.f32 %v1987_v14, %v2312_v51  ;;  %v640_v4 = vpop.f32.mrb[61].mxu0 }
 0x157   :  { %1082 = vmatmul.mubr.bf16.gmra.mrb[40].mxu1 %v2375_v3  ;;  %v641_v18 = vadd.f32 %v2312_v51, %v640_v4  ;;  %v1988_v19 = vpop.f32.mrb[62].mxu0 }
 0x158   :  { %1091 = vmatprep.mubr.bf16.mxu1 %v2091_v44  ;;  %v717_v20 = vmax.f32 %v649_v15, 0.0  ;;  %v652_v21 = vadd.f32 %v1988_v19, %v2312_v51  ;;  %v643_v22 = vpop.f32.mrb[63].mxu0 }
 0x159   :  { %v715_v23 = vmax.f32 %v641_v18, 0.0  ;;  %v644_v24 = vadd.f32 %v2312_v51, %v643_v22  ;;  %v769_v51 = vlaneseq }
 0x15a   :  { %v718_v25 = vmax.f32 %v652_v21, 0.0 }
 0x15b   :  { %v716_v26 = vmax.f32 %v644_v24, 0.0  ;;  %v770_v3 = vshrl.u32 %v769_v51, 7 }
 0x15c   :  { %v750_v27 = vpack.c.bf16 %v718_v25, %v717_v20 }
 0x15d   :  { %v749_v28 = vpack.c.bf16 %v716_v26, %v715_v23  ;;  %v775_v29 = vsub.s32 1, %v770_v3 }
 0x15f   :  { %1092 = vmatmul.mubr.bf16.gmra.mrb[44].mxu1 %v2386_v17  ;;  %v767_v17 = vld [vmem:[%s2586_s4] sm:$0x3]  ;;  %s2092_s4 = smov [#allocation2]  }
 0x160   :  { %1101 = vmatprep.mubr.bf16.mxu1 %v2091_v44  ;;  %s1665_s15 = sshll.u32 %s2092_s4, 4  ;;  %s1666_s15 = int_to_ptr.vmem [resolvable:$true] %s1665_s15 }
 0x161   :  { %s2067_s16 = scalar_lea.vmem %s1666_s15, 8192  ;;  %p2072_p1 = scmp.lt.s32.totalorder %s1666_s15, %s1666_s15 }
 0x162   :  { %p2068_p0 = scmp.ne.s32.totalorder %s1666_s15, %s2067_s16  ;;  %p2073_p2 = scmp.lt.s32.totalorder %s2067_s16, %s2067_s16 }
 0x164   :  { %p2074_p3 = por %p2073_p2, %p2072_p1 }
 0x166   :  { %p2075_p4 = pnand %p2074_p3, %p2068_p0 }
 0x167   :  { %1102 = vmatmul.mubr.bf16.gmra.mrb[48].mxu1 %v2384_v16  ;;  %v771_v16 = vsub.s32 0, %v770_v3 }
 0x168   :  { %1111 = vmatprep.mubr.bf16.mxu1 %v2091_v44 }
 0x16f   :  { %1112 = vmatmul.mubr.bf16.gmra.mrb[52].mxu1 %v2395_v31  ;;  %v2440_v31 = vrot.slane %v767_v17, %v775_v29 }
 0x170   :  { %1121 = vmatprep.mubr.bf16.mxu1 %v2091_v44 }
 0x177   :  { %1122 = vmatmul.mubr.bf16.gmra.mrb[56].mxu1 %v2393_v30  ;;  %v2438_v30 = vrot.slane %v767_v17, %v771_v16 }
 0x178   :  { %1131 = vmatprep.mubr.bf16.mxu1 %v2091_v44 }
 0x17f   :  { %1132 = vmatmul.mubr.bf16.gmra.mrb[60].mxu1 %v743_v47 }
 0x180   :  { %1141 = vmatprep.mubr.bf16.mxu1 %v2091_v44 }
 0x187   :  { %1142 = vmatmul.mubr.bf16.gmra.mrb[64].mxu1 %v744_v46 }
 0x188   :  { %1151 = vmatprep.mubr.bf16.mxu1 %v2091_v44 }
 0x18f   :  { %1152 = vmatmul.mubr.bf16.gmra.mrb[68].mxu1 %v745_v63 }
 0x190   :  { %1161 = vmatprep.mubr.bf16.mxu1 %v2091_v44 }
 0x197   :  { %1162 = vmatmul.mubr.bf16.gmra.mrb[72].mxu1 %v746_v62 }
 0x198   :  { %1171 = vmatprep.mubr.bf16.mxu1 %v2091_v44 }
 0x19f   :  { %1172 = vmatmul.mubr.bf16.gmra.mrb[76].mxu1 %v747_v13 }
 0x1a0   :  { %1181 = vmatprep.mubr.bf16.mxu1 %v2091_v44 }
 0x1a7   :  { %1182 = vmatmul.mubr.bf16.gmra.mrb[80].mxu1 %v748_v12 }
 0x1a8   :  { %1191 = vmatprep.mubr.bf16.mxu1 %v2091_v44 }
 0x1af   :  { %1192 = vmatmul.mubr.bf16.gmra.mrb[84].mxu1 %v749_v28 }
 0x1b0   :  { %1201 = vmatprep.mubr.bf16.mxu1 %v2091_v44 }
 0x1b7   :  { %1202 = vmatmul.mubr.bf16.gmra.mrb[88].mxu1 %v750_v27 }
 0x1ba   :  { %v893_v32 = vpop.f32.mrb[64].mxu0 }
 0x1bb   :  { %v894_v33 = vadd.f32 %v893_v32, %v2438_v30  ;;  %v895_v34 = vpop.f32.mrb[65].mxu0 }
 0x1bc   :  { %v896_v35 = vadd.f32 %v895_v34, %v2440_v31  ;;  %v897_v36 = vpop.f32.mrb[66].mxu0 }
 0x1bd   :  { %v898_v44 = vadd.f32 %v897_v36, %v2438_v30  ;;  %v899_v37 = vpop.f32.mrb[67].mxu0 }
 0x1be   :  { %v1823_v38 = vpack.c.bf16 %v896_v35, %v894_v33  ;;  %v900_v39 = vadd.f32 %v899_v37, %v2440_v31 }
 0x1c0   :  { %1596 = vst [vmem:[#allocation2] sm:$0xff] %v1823_v38  ;;  %v1824_v40 = vpack.c.bf16 %v900_v39, %v898_v44 }
 0x1c2   :  { %1597 = vst [vmem:[#allocation2 + $0x8] sm:$0xff] %v1824_v40  ;;  %v903_v41 = vpop.f32.mrb[68].mxu0 }
 0x1c3   :  { %v904_v43 = vadd.f32 %v903_v41, %v2438_v30  ;;  %v905_v45 = vpop.f32.mrb[69].mxu0 }
 0x1c4   :  { %v906_v46 = vadd.f32 %v905_v45, %v2440_v31  ;;  %v907_v47 = vpop.f32.mrb[70].mxu0 }
 0x1c5   :  { %v908_v48 = vadd.f32 %v907_v47, %v2438_v30  ;;  %v909_v49 = vpop.f32.mrb[71].mxu0 }
 0x1c6   :  { %v1825_v50 = vpack.c.bf16 %v906_v46, %v904_v43  ;;  %v910_v52 = vadd.f32 %v909_v49, %v2440_v31 }
 0x1c8   :  { %1598 = vst [vmem:[#allocation2 + $0x10] sm:$0xff] %v1825_v50  ;;  %v1826_v42 = vpack.c.bf16 %v910_v52, %v908_v48 }
 0x1ca   :  { %1599 = vst [vmem:[#allocation2 + $0x18] sm:$0xff] %v1826_v42  ;;  %v913_v54 = vpop.f32.mrb[72].mxu0 }
 0x1cb   :  { %v914_v55 = vadd.f32 %v913_v54, %v2438_v30  ;;  %v915_v56 = vpop.f32.mrb[73].mxu0 }
 0x1cc   :  { %v916_v57 = vadd.f32 %v915_v56, %v2440_v31  ;;  %v917_v58 = vpop.f32.mrb[74].mxu0 }
 0x1cd   :  { %v918_v60 = vadd.f32 %v917_v58, %v2438_v30  ;;  %v919_v61 = vpop.f32.mrb[75].mxu0 }
 0x1ce   :  { %v1827_v62 = vpack.c.bf16 %v916_v57, %v914_v55  ;;  %v920_v63 = vadd.f32 %v919_v61, %v2440_v31 }
 0x1d0   :  { %1600 = vst [vmem:[#allocation2 + $0x20] sm:$0xff] %v1827_v62  ;;  %v1828_v0 = vpack.c.bf16 %v920_v63, %v918_v60 }
 0x1d2   :  { %1601 = vst [vmem:[#allocation2 + $0x28] sm:$0xff] %v1828_v0  ;;  %v923_v1 = vpop.f32.mrb[76].mxu0 }
 0x1d3   :  { %v924_v53 = vadd.f32 %v923_v1, %v2438_v30  ;;  %v925_v2 = vpop.f32.mrb[77].mxu0 }
 0x1d4   :  { %v926_v59 = vadd.f32 %v925_v2, %v2440_v31  ;;  %v927_v5 = vpop.f32.mrb[78].mxu0 }
 0x1d5   :  { %v928_v6 = vadd.f32 %v927_v5, %v2438_v30  ;;  %v929_v7 = vpop.f32.mrb[79].mxu0 }
 0x1d6   :  { %v1829_v8 = vpack.c.bf16 %v926_v59, %v924_v53  ;;  %v930_v9 = vadd.f32 %v929_v7, %v2440_v31 }
 0x1d8   :  { %1602 = vst [vmem:[#allocation2 + $0x30] sm:$0xff] %v1829_v8  ;;  %v1830_v10 = vpack.c.bf16 %v930_v9, %v928_v6 }
 0x1d9   :  { %v983_v11 = vpop.f32.mrb[0].mxu1 }
 0x1da   :  { %1603 = vst [vmem:[#allocation2 + $0x38] sm:$0xff] %v1830_v10  ;;  %v984_v12 = vadd.f32 %v983_v11, %v2438_v30  ;;  %v933_v13 = vpop.f32.mrb[80].mxu0  ;;  %v985_v14 = vpop.f32.mrb[1].mxu1 }
 0x1db   :  { %v934_v15 = vadd.f32 %v933_v13, %v2438_v30  ;;  %v986_v4 = vadd.f32 %v985_v14, %v2440_v31  ;;  %v935_v18 = vpop.f32.mrb[81].mxu0  ;;  %v987_v19 = vpop.f32.mrb[2].mxu1 }
 0x1dc   :  { %v936_v20 = vadd.f32 %v935_v18, %v2440_v31  ;;  %v988_v21 = vadd.f32 %v987_v19, %v2438_v30  ;;  %v937_v22 = vpop.f32.mrb[82].mxu0  ;;  %v989_v23 = vpop.f32.mrb[3].mxu1 }
 0x1dd   :  { %v1841_v24 = vpack.c.bf16 %v986_v4, %v984_v12  ;;  %v938_v25 = vadd.f32 %v937_v22, %v2438_v30  ;;  %v990_v26 = vadd.f32 %v989_v23, %v2440_v31  ;;  %v939_v27 = vpop.f32.mrb[83].mxu0 }
 0x1de   :  { %v1831_v28 = vpack.c.bf16 %v936_v20, %v934_v15  ;;  %v940_v51 = vadd.f32 %v939_v27, %v2440_v31 }
 0x1df   :  { %1614 = vst [vmem:[#allocation2 + $0x90] sm:$0xff] %v1841_v24  ;;  %v1842_v3 = vpack.c.bf16 %v990_v26, %v988_v21 }
 0x1e0   :  { %1604 = vst [vmem:[#allocation2 + $0x40] sm:$0xff] %v1831_v28  ;;  %v1832_v16 = vpack.c.bf16 %v940_v51, %v938_v25 }
 0x1e1   :  { %1615 = vst [vmem:[#allocation2 + $0x98] sm:$0xff] %v1842_v3 }
 0x1e2   :  { %1605 = vst [vmem:[#allocation2 + $0x48] sm:$0xff] %v1832_v16  ;;  %v943_v17 = vpop.f32.mrb[84].mxu0  ;;  %v993_v29 = vpop.f32.mrb[4].mxu1 }
 0x1e3   :  { %v944_v32 = vadd.f32 %v943_v17, %v2438_v30  ;;  %v994_v33 = vadd.f32 %v993_v29, %v2438_v30  ;;  %v945_v34 = vpop.f32.mrb[85].mxu0  ;;  %v995_v35 = vpop.f32.mrb[5].mxu1 }
 0x1e4   :  { %v946_v36 = vadd.f32 %v945_v34, %v2440_v31  ;;  %v996_v44 = vadd.f32 %v995_v35, %v2440_v31  ;;  %v947_v37 = vpop.f32.mrb[86].mxu0  ;;  %v997_v38 = vpop.f32.mrb[6].mxu1 }
 0x1e5   :  { %v948_v39 = vadd.f32 %v947_v37, %v2438_v30  ;;  %v998_v40 = vadd.f32 %v997_v38, %v2438_v30  ;;  %v949_v41 = vpop.f32.mrb[87].mxu0  ;;  %v999_v43 = vpop.f32.mrb[7].mxu1 }
 0x1e6   :  { %v1833_v45 = vpack.c.bf16 %v946_v36, %v944_v32  ;;  %v1843_v46 = vpack.c.bf16 %v996_v44, %v994_v33  ;;  %v950_v47 = vadd.f32 %v949_v41, %v2440_v31  ;;  %v1000_v48 = vadd.f32 %v999_v43, %v2440_v31 }
 0x1e8   :  { %1606 = vst [vmem:[#allocation2 + $0x50] sm:$0xff] %v1833_v45  ;;  %1616 = vst [vmem:[#allocation2 + $0xa0] sm:$0xff] %v1843_v46  ;;  %v1834_v49 = vpack.c.bf16 %v950_v47, %v948_v39  ;;  %v1844_v50 = vpack.c.bf16 %v1000_v48, %v998_v40 }
 0x1ea   :  { %1607 = vst [vmem:[#allocation2 + $0x58] sm:$0xff] %v1834_v49  ;;  %1617 = vst [vmem:[#allocation2 + $0xa8] sm:$0xff] %v1844_v50  ;;  %v953_v52 = vpop.f32.mrb[88].mxu0  ;;  %v1003_v42 = vpop.f32.mrb[8].mxu1 }
 0x1eb   :  { %v954_v54 = vadd.f32 %v953_v52, %v2438_v30  ;;  %v1004_v55 = vadd.f32 %v1003_v42, %v2438_v30  ;;  %v955_v56 = vpop.f32.mrb[89].mxu0  ;;  %v1005_v57 = vpop.f32.mrb[9].mxu1 }
 0x1ec   :  { %v956_v58 = vadd.f32 %v955_v56, %v2440_v31  ;;  %v1006_v60 = vadd.f32 %v1005_v57, %v2440_v31  ;;  %v957_v61 = vpop.f32.mrb[90].mxu0  ;;  %v1007_v62 = vpop.f32.mrb[10].mxu1 }
 0x1ed   :  { %v958_v63 = vadd.f32 %v957_v61, %v2438_v30  ;;  %v1008_v0 = vadd.f32 %v1007_v62, %v2438_v30  ;;  %v959_v1 = vpop.f32.mrb[91].mxu0  ;;  %v1009_v53 = vpop.f32.mrb[11].mxu1 }
 0x1ee   :  { %v1835_v2 = vpack.c.bf16 %v956_v58, %v954_v54  ;;  %v1845_v59 = vpack.c.bf16 %v1006_v60, %v1004_v55  ;;  %v960_v5 = vadd.f32 %v959_v1, %v2440_v31  ;;  %v1010_v6 = vadd.f32 %v1009_v53, %v2440_v31 }
 0x1f0   :  { %1608 = vst [vmem:[#allocation2 + $0x60] sm:$0xff] %v1835_v2  ;;  %1618 = vst [vmem:[#allocation2 + $0xb0] sm:$0xff] %v1845_v59  ;;  %v1836_v7 = vpack.c.bf16 %v960_v5, %v958_v63  ;;  %v1846_v8 = vpack.c.bf16 %v1010_v6, %v1008_v0 }
 0x1f2   :  { %1609 = vst [vmem:[#allocation2 + $0x68] sm:$0xff] %v1836_v7  ;;  %1619 = vst [vmem:[#allocation2 + $0xb8] sm:$0xff] %v1846_v8  ;;  %v963_v9 = vpop.f32.mrb[92].mxu0  ;;  %v1013_v10 = vpop.f32.mrb[12].mxu1 }
 0x1f3   :  { %v964_v11 = vadd.f32 %v963_v9, %v2438_v30  ;;  %v1014_v12 = vadd.f32 %v1013_v10, %v2438_v30  ;;  %v965_v13 = vpop.f32.mrb[93].mxu0  ;;  %v1015_v14 = vpop.f32.mrb[13].mxu1 }
 0x1f4   :  { %v966_v15 = vadd.f32 %v965_v13, %v2440_v31  ;;  %v1016_v4 = vadd.f32 %v1015_v14, %v2440_v31  ;;  %v967_v18 = vpop.f32.mrb[94].mxu0  ;;  %v1017_v19 = vpop.f32.mrb[14].mxu1 }
 0x1f5   :  { %v968_v20 = vadd.f32 %v967_v18, %v2438_v30  ;;  %v1018_v21 = vadd.f32 %v1017_v19, %v2438_v30  ;;  %v969_v22 = vpop.f32.mrb[95].mxu0  ;;  %v1019_v23 = vpop.f32.mrb[15].mxu1 }
 0x1f6   :  { %v1837_v24 = vpack.c.bf16 %v966_v15, %v964_v11  ;;  %v1847_v25 = vpack.c.bf16 %v1016_v4, %v1014_v12  ;;  %v970_v26 = vadd.f32 %v969_v22, %v2440_v31  ;;  %v1020_v27 = vadd.f32 %v1019_v23, %v2440_v31 }
 0x1f8   :  { %1610 = vst [vmem:[#allocation2 + $0x70] sm:$0xff] %v1837_v24  ;;  %1620 = vst [vmem:[#allocation2 + $0xc0] sm:$0xff] %v1847_v25  ;;  %v1838_v28 = vpack.c.bf16 %v970_v26, %v968_v20  ;;  %v1848_v51 = vpack.c.bf16 %v1020_v27, %v1018_v21 }
 0x1fa   :  { %1611 = vst [vmem:[#allocation2 + $0x78] sm:$0xff] %v1838_v28  ;;  %1621 = vst [vmem:[#allocation2 + $0xc8] sm:$0xff] %v1848_v51  ;;  %v973_v3 = vpop.f32.mrb[96].mxu0  ;;  %v1023_v16 = vpop.f32.mrb[16].mxu1 }
 0x1fb   :  { %v974_v17 = vadd.f32 %v973_v3, %v2438_v30  ;;  %v1024_v29 = vadd.f32 %v1023_v16, %v2438_v30  ;;  %v975_v32 = vpop.f32.mrb[97].mxu0  ;;  %v1025_v33 = vpop.f32.mrb[17].mxu1 }
 0x1fc   :  { %v976_v34 = vadd.f32 %v975_v32, %v2440_v31  ;;  %v1026_v35 = vadd.f32 %v1025_v33, %v2440_v31  ;;  %v977_v36 = vpop.f32.mrb[98].mxu0  ;;  %v1027_v44 = vpop.f32.mrb[18].mxu1 }
 0x1fd   :  { %v978_v37 = vadd.f32 %v977_v36, %v2438_v30  ;;  %v1028_v38 = vadd.f32 %v1027_v44, %v2438_v30  ;;  %v979_v39 = vpop.f32.mrb[99].mxu0  ;;  %v1029_v40 = vpop.f32.mrb[19].mxu1 }
 0x1fe   :  { %v1839_v41 = vpack.c.bf16 %v976_v34, %v974_v17  ;;  %v1849_v43 = vpack.c.bf16 %v1026_v35, %v1024_v29  ;;  %v980_v45 = vadd.f32 %v979_v39, %v2440_v31  ;;  %v1030_v46 = vadd.f32 %v1029_v40, %v2440_v31 }
 0x200   :  { %1612 = vst [vmem:[#allocation2 + $0x80] sm:$0xff] %v1839_v41  ;;  %1622 = vst [vmem:[#allocation2 + $0xd0] sm:$0xff] %v1849_v43  ;;  %v1840_v47 = vpack.c.bf16 %v980_v45, %v978_v37  ;;  %v1850_v48 = vpack.c.bf16 %v1030_v46, %v1028_v38 }
 0x202   :  { %1613 = vst [vmem:[#allocation2 + $0x88] sm:$0xff] %v1840_v47  ;;  %1623 = vst [vmem:[#allocation2 + $0xd8] sm:$0xff] %v1850_v48  ;;  %v1033_v49 = vpop.f32.mrb[20].mxu1 }
 0x203   :  { %v1034_v50 = vadd.f32 %v1033_v49, %v2438_v30  ;;  %v1035_v52 = vpop.f32.mrb[21].mxu1 }
 0x204   :  { %v1036_v42 = vadd.f32 %v1035_v52, %v2440_v31  ;;  %v1037_v54 = vpop.f32.mrb[22].mxu1 }
 0x205   :  { %v1038_v55 = vadd.f32 %v1037_v54, %v2438_v30  ;;  %v1039_v56 = vpop.f32.mrb[23].mxu1 }
 0x206   :  { %v1851_v57 = vpack.c.bf16 %v1036_v42, %v1034_v50  ;;  %v1040_v58 = vadd.f32 %v1039_v56, %v2440_v31 }
 0x208   :  { %1624 = vst [vmem:[#allocation2 + $0xe0] sm:$0xff] %v1851_v57  ;;  %v1852_v60 = vpack.c.bf16 %v1040_v58, %v1038_v55 }
 0x20a   :  { %1625 = vst [vmem:[#allocation2 + $0xe8] sm:$0xff] %v1852_v60  ;;  %v1043_v61 = vpop.f32.mrb[24].mxu1 }
 0x20b   :  { %v1044_v62 = vadd.f32 %v1043_v61, %v2438_v30  ;;  %v1045_v63 = vpop.f32.mrb[25].mxu1 }
 0x20c   :  { %v1046_v0 = vadd.f32 %v1045_v63, %v2440_v31  ;;  %v1047_v1 = vpop.f32.mrb[26].mxu1 }
 0x20d   :  { %v1048_v53 = vadd.f32 %v1047_v1, %v2438_v30  ;;  %v1049_v2 = vpop.f32.mrb[27].mxu1 }
 0x20e   :  { %v1853_v59 = vpack.c.bf16 %v1046_v0, %v1044_v62  ;;  %v1050_v5 = vadd.f32 %v1049_v2, %v2440_v31 }
 0x210   :  { %1626 = vst [vmem:[#allocation2 + $0xf0] sm:$0xff] %v1853_v59  ;;  %v1854_v6 = vpack.c.bf16 %v1050_v5, %v1048_v53 }
 0x212   :  { %1627 = vst [vmem:[#allocation2 + $0xf8] sm:$0xff] %v1854_v6  ;;  %v1053_v7 = vpop.f32.mrb[28].mxu1 }
 0x213   :  { %v1054_v8 = vadd.f32 %v1053_v7, %v2438_v30  ;;  %v1055_v9 = vpop.f32.mrb[29].mxu1 }
 0x214   :  { %v1056_v10 = vadd.f32 %v1055_v9, %v2440_v31  ;;  %v1057_v11 = vpop.f32.mrb[30].mxu1 }
 0x215   :  { %v1058_v12 = vadd.f32 %v1057_v11, %v2438_v30  ;;  %v1059_v13 = vpop.f32.mrb[31].mxu1 }
 0x216   :  { %v1855_v14 = vpack.c.bf16 %v1056_v10, %v1054_v8  ;;  %v1060_v15 = vadd.f32 %v1059_v13, %v2440_v31 }
 0x218   :  { %1628 = vst [vmem:[#allocation2 + $0x100] sm:$0xff] %v1855_v14  ;;  %v1856_v4 = vpack.c.bf16 %v1060_v15, %v1058_v12 }
 0x21a   :  { %1629 = vst [vmem:[#allocation2 + $0x108] sm:$0xff] %v1856_v4  ;;  %v1063_v18 = vpop.f32.mrb[32].mxu1 }
 0x21b   :  { %v1064_v19 = vadd.f32 %v1063_v18, %v2438_v30  ;;  %v1065_v20 = vpop.f32.mrb[33].mxu1 }
 0x21c   :  { %v1066_v21 = vadd.f32 %v1065_v20, %v2440_v31  ;;  %v1067_v22 = vpop.f32.mrb[34].mxu1 }
 0x21d   :  { %v1068_v23 = vadd.f32 %v1067_v22, %v2438_v30  ;;  %v1069_v24 = vpop.f32.mrb[35].mxu1 }
 0x21e   :  { %v1857_v25 = vpack.c.bf16 %v1066_v21, %v1064_v19  ;;  %v1070_v26 = vadd.f32 %v1069_v24, %v2440_v31 }
 0x220   :  { %1630 = vst [vmem:[#allocation2 + $0x110] sm:$0xff] %v1857_v25  ;;  %v1858_v27 = vpack.c.bf16 %v1070_v26, %v1068_v23 }
 0x222   :  { %1631 = vst [vmem:[#allocation2 + $0x118] sm:$0xff] %v1858_v27  ;;  %v1073_v28 = vpop.f32.mrb[36].mxu1 }
 0x223   :  { %v1074_v51 = vadd.f32 %v1073_v28, %v2438_v30  ;;  %v1075_v3 = vpop.f32.mrb[37].mxu1 }
 0x224   :  { %v1076_v16 = vadd.f32 %v1075_v3, %v2440_v31  ;;  %v1077_v17 = vpop.f32.mrb[38].mxu1 }
 0x225   :  { %v1078_v29 = vadd.f32 %v1077_v17, %v2438_v30  ;;  %v1079_v32 = vpop.f32.mrb[39].mxu1 }
 0x226   :  { %v1859_v33 = vpack.c.bf16 %v1076_v16, %v1074_v51  ;;  %v1080_v34 = vadd.f32 %v1079_v32, %v2440_v31 }
 0x228   :  { %1632 = vst [vmem:[#allocation2 + $0x120] sm:$0xff] %v1859_v33  ;;  %v1860_v35 = vpack.c.bf16 %v1080_v34, %v1078_v29 }
 0x22a   :  { %1633 = vst [vmem:[#allocation2 + $0x128] sm:$0xff] %v1860_v35  ;;  %v1083_v36 = vpop.f32.mrb[40].mxu1 }
 0x22b   :  { %v1084_v44 = vadd.f32 %v1083_v36, %v2438_v30  ;;  %v1085_v37 = vpop.f32.mrb[41].mxu1 }
 0x22c   :  { %v1086_v38 = vadd.f32 %v1085_v37, %v2440_v31  ;;  %v1087_v39 = vpop.f32.mrb[42].mxu1 }
 0x22d   :  { %v1088_v40 = vadd.f32 %v1087_v39, %v2438_v30  ;;  %v1089_v41 = vpop.f32.mrb[43].mxu1 }
 0x22e   :  { %v1861_v43 = vpack.c.bf16 %v1086_v38, %v1084_v44  ;;  %v1090_v45 = vadd.f32 %v1089_v41, %v2440_v31 }
 0x230   :  { %1634 = vst [vmem:[#allocation2 + $0x130] sm:$0xff] %v1861_v43  ;;  %v1862_v46 = vpack.c.bf16 %v1090_v45, %v1088_v40 }
 0x232   :  { %1635 = vst [vmem:[#allocation2 + $0x138] sm:$0xff] %v1862_v46  ;;  %v1093_v47 = vpop.f32.mrb[44].mxu1 }
 0x233   :  { %v1094_v48 = vadd.f32 %v1093_v47, %v2438_v30  ;;  %v1095_v49 = vpop.f32.mrb[45].mxu1 }
 0x234   :  { %v1096_v50 = vadd.f32 %v1095_v49, %v2440_v31  ;;  %v1097_v52 = vpop.f32.mrb[46].mxu1 }
 0x235   :  { %v1098_v42 = vadd.f32 %v1097_v52, %v2438_v30  ;;  %v1099_v54 = vpop.f32.mrb[47].mxu1 }
 0x236   :  { %v1863_v55 = vpack.c.bf16 %v1096_v50, %v1094_v48  ;;  %v1100_v56 = vadd.f32 %v1099_v54, %v2440_v31 }
 0x238   :  { %1636 = vst [vmem:[#allocation2 + $0x140] sm:$0xff] %v1863_v55  ;;  %v1864_v57 = vpack.c.bf16 %v1100_v56, %v1098_v42 }
 0x23a   :  { %1637 = vst [vmem:[#allocation2 + $0x148] sm:$0xff] %v1864_v57  ;;  %v1103_v58 = vpop.f32.mrb[48].mxu1 }
 0x23b   :  { %v1104_v60 = vadd.f32 %v1103_v58, %v2438_v30  ;;  %v1105_v61 = vpop.f32.mrb[49].mxu1 }
 0x23c   :  { %v1106_v62 = vadd.f32 %v1105_v61, %v2440_v31  ;;  %v1107_v63 = vpop.f32.mrb[50].mxu1 }
 0x23d   :  { %v1108_v0 = vadd.f32 %v1107_v63, %v2438_v30  ;;  %v1109_v1 = vpop.f32.mrb[51].mxu1 }
 0x23e   :  { %v1865_v53 = vpack.c.bf16 %v1106_v62, %v1104_v60  ;;  %v1110_v2 = vadd.f32 %v1109_v1, %v2440_v31 }
 0x240   :  { %1638 = vst [vmem:[#allocation2 + $0x150] sm:$0xff] %v1865_v53  ;;  %v1866_v59 = vpack.c.bf16 %v1110_v2, %v1108_v0 }
 0x242   :  { %1639 = vst [vmem:[#allocation2 + $0x158] sm:$0xff] %v1866_v59  ;;  %v1113_v5 = vpop.f32.mrb[52].mxu1 }
 0x243   :  { %v1114_v6 = vadd.f32 %v1113_v5, %v2438_v30  ;;  %v1115_v7 = vpop.f32.mrb[53].mxu1 }
 0x244   :  { %v1116_v8 = vadd.f32 %v1115_v7, %v2440_v31  ;;  %v1117_v9 = vpop.f32.mrb[54].mxu1 }
 0x245   :  { %v1118_v10 = vadd.f32 %v1117_v9, %v2438_v30  ;;  %v1119_v11 = vpop.f32.mrb[55].mxu1 }
 0x246   :  { %v1867_v12 = vpack.c.bf16 %v1116_v8, %v1114_v6  ;;  %v1120_v13 = vadd.f32 %v1119_v11, %v2440_v31 }
 0x248   :  { %1640 = vst [vmem:[#allocation2 + $0x160] sm:$0xff] %v1867_v12  ;;  %v1868_v14 = vpack.c.bf16 %v1120_v13, %v1118_v10 }
 0x24a   :  { %1641 = vst [vmem:[#allocation2 + $0x168] sm:$0xff] %v1868_v14  ;;  %v1123_v15 = vpop.f32.mrb[56].mxu1 }
 0x24b   :  { %v1124_v4 = vadd.f32 %v1123_v15, %v2438_v30  ;;  %v1125_v18 = vpop.f32.mrb[57].mxu1 }
 0x24c   :  { %v1126_v19 = vadd.f32 %v1125_v18, %v2440_v31  ;;  %v1127_v20 = vpop.f32.mrb[58].mxu1 }
 0x24d   :  { %v1128_v21 = vadd.f32 %v1127_v20, %v2438_v30  ;;  %v1129_v22 = vpop.f32.mrb[59].mxu1 }
 0x24e   :  { %v1869_v23 = vpack.c.bf16 %v1126_v19, %v1124_v4  ;;  %v1130_v24 = vadd.f32 %v1129_v22, %v2440_v31 }
 0x250   :  { %1642 = vst [vmem:[#allocation2 + $0x170] sm:$0xff] %v1869_v23  ;;  %v1870_v25 = vpack.c.bf16 %v1130_v24, %v1128_v21 }
 0x252   :  { %1643 = vst [vmem:[#allocation2 + $0x178] sm:$0xff] %v1870_v25  ;;  %v1133_v26 = vpop.f32.mrb[60].mxu1 }
 0x253   :  { %v1134_v27 = vadd.f32 %v1133_v26, %v2438_v30  ;;  %v1135_v28 = vpop.f32.mrb[61].mxu1 }
 0x254   :  { %v1136_v51 = vadd.f32 %v1135_v28, %v2440_v31  ;;  %v1137_v3 = vpop.f32.mrb[62].mxu1 }
 0x255   :  { %v1138_v16 = vadd.f32 %v1137_v3, %v2438_v30  ;;  %v1139_v17 = vpop.f32.mrb[63].mxu1 }
 0x256   :  { %v1871_v29 = vpack.c.bf16 %v1136_v51, %v1134_v27  ;;  %v1140_v32 = vadd.f32 %v1139_v17, %v2440_v31 }
 0x258   :  { %1644 = vst [vmem:[#allocation2 + $0x180] sm:$0xff] %v1871_v29  ;;  %v1872_v33 = vpack.c.bf16 %v1140_v32, %v1138_v16 }
 0x25a   :  { %1645 = vst [vmem:[#allocation2 + $0x188] sm:$0xff] %v1872_v33  ;;  %v1143_v34 = vpop.f32.mrb[64].mxu1 }
 0x25b   :  { %v1144_v35 = vadd.f32 %v1143_v34, %v2438_v30  ;;  %v1145_v36 = vpop.f32.mrb[65].mxu1 }
 0x25c   :  { %v1146_v44 = vadd.f32 %v1145_v36, %v2440_v31  ;;  %v1147_v37 = vpop.f32.mrb[66].mxu1 }
 0x25d   :  { %v1148_v38 = vadd.f32 %v1147_v37, %v2438_v30  ;;  %v1149_v39 = vpop.f32.mrb[67].mxu1 }
 0x25e   :  { %v1873_v40 = vpack.c.bf16 %v1146_v44, %v1144_v35  ;;  %v1150_v41 = vadd.f32 %v1149_v39, %v2440_v31 }
 0x260   :  { %1646 = vst [vmem:[#allocation2 + $0x190] sm:$0xff] %v1873_v40  ;;  %v1874_v43 = vpack.c.bf16 %v1150_v41, %v1148_v38 }
 0x262   :  { %1647 = vst [vmem:[#allocation2 + $0x198] sm:$0xff] %v1874_v43  ;;  %v1153_v45 = vpop.f32.mrb[68].mxu1 }
 0x263   :  { %v1154_v46 = vadd.f32 %v1153_v45, %v2438_v30  ;;  %v1155_v47 = vpop.f32.mrb[69].mxu1 }
 0x264   :  { %v1156_v48 = vadd.f32 %v1155_v47, %v2440_v31  ;;  %v1157_v49 = vpop.f32.mrb[70].mxu1 }
 0x265   :  { %v1158_v50 = vadd.f32 %v1157_v49, %v2438_v30  ;;  %v1159_v52 = vpop.f32.mrb[71].mxu1 }
 0x266   :  { %v1875_v42 = vpack.c.bf16 %v1156_v48, %v1154_v46  ;;  %v1160_v54 = vadd.f32 %v1159_v52, %v2440_v31 }
 0x268   :  { %1648 = vst [vmem:[#allocation2 + $0x1a0] sm:$0xff] %v1875_v42  ;;  %v1876_v55 = vpack.c.bf16 %v1160_v54, %v1158_v50 }
 0x26a   :  { %1649 = vst [vmem:[#allocation2 + $0x1a8] sm:$0xff] %v1876_v55  ;;  %v1163_v56 = vpop.f32.mrb[72].mxu1 }
 0x26b   :  { %v1164_v57 = vadd.f32 %v1163_v56, %v2438_v30  ;;  %v1165_v58 = vpop.f32.mrb[73].mxu1 }
 0x26c   :  { %v1166_v60 = vadd.f32 %v1165_v58, %v2440_v31  ;;  %v1167_v61 = vpop.f32.mrb[74].mxu1 }
 0x26d   :  { %v1168_v62 = vadd.f32 %v1167_v61, %v2438_v30  ;;  %v1169_v63 = vpop.f32.mrb[75].mxu1 }
 0x26e   :  { %v1877_v0 = vpack.c.bf16 %v1166_v60, %v1164_v57  ;;  %v1170_v1 = vadd.f32 %v1169_v63, %v2440_v31 }
 0x270   :  { %1650 = vst [vmem:[#allocation2 + $0x1b0] sm:$0xff] %v1877_v0  ;;  %v1878_v53 = vpack.c.bf16 %v1170_v1, %v1168_v62 }
 0x272   :  { %1651 = vst [vmem:[#allocation2 + $0x1b8] sm:$0xff] %v1878_v53  ;;  %v1173_v2 = vpop.f32.mrb[76].mxu1 }
 0x273   :  { %v1174_v59 = vadd.f32 %v1173_v2, %v2438_v30  ;;  %v1175_v5 = vpop.f32.mrb[77].mxu1 }
 0x274   :  { %v1176_v6 = vadd.f32 %v1175_v5, %v2440_v31  ;;  %v1177_v7 = vpop.f32.mrb[78].mxu1 }
 0x275   :  { %v1178_v8 = vadd.f32 %v1177_v7, %v2438_v30  ;;  %v1179_v9 = vpop.f32.mrb[79].mxu1 }
 0x276   :  { %v1879_v10 = vpack.c.bf16 %v1176_v6, %v1174_v59  ;;  %v1180_v11 = vadd.f32 %v1179_v9, %v2440_v31 }
 0x278   :  { %1652 = vst [vmem:[#allocation2 + $0x1c0] sm:$0xff] %v1879_v10  ;;  %v1880_v12 = vpack.c.bf16 %v1180_v11, %v1178_v8 }
 0x27a   :  { %1653 = vst [vmem:[#allocation2 + $0x1c8] sm:$0xff] %v1880_v12  ;;  %v1183_v13 = vpop.f32.mrb[80].mxu1 }
 0x27b   :  { %v1184_v14 = vadd.f32 %v1183_v13, %v2438_v30  ;;  %v1185_v15 = vpop.f32.mrb[81].mxu1 }
 0x27c   :  { %v1186_v4 = vadd.f32 %v1185_v15, %v2440_v31  ;;  %v1187_v18 = vpop.f32.mrb[82].mxu1 }
 0x27d   :  { %v1188_v19 = vadd.f32 %v1187_v18, %v2438_v30  ;;  %v1189_v20 = vpop.f32.mrb[83].mxu1 }
 0x27e   :  { %v1881_v21 = vpack.c.bf16 %v1186_v4, %v1184_v14  ;;  %v1190_v22 = vadd.f32 %v1189_v20, %v2440_v31 }
 0x280   :  { %1654 = vst [vmem:[#allocation2 + $0x1d0] sm:$0xff] %v1881_v21  ;;  %v1882_v23 = vpack.c.bf16 %v1190_v22, %v1188_v19 }
 0x282   :  { %1655 = vst [vmem:[#allocation2 + $0x1d8] sm:$0xff] %v1882_v23  ;;  %v1193_v24 = vpop.f32.mrb[84].mxu1 }
 0x283   :  { %v1194_v25 = vadd.f32 %v1193_v24, %v2438_v30  ;;  %v1195_v26 = vpop.f32.mrb[85].mxu1 }
 0x284   :  { %v1196_v27 = vadd.f32 %v1195_v26, %v2440_v31  ;;  %v1197_v28 = vpop.f32.mrb[86].mxu1 }
 0x285   :  { %v1198_v51 = vadd.f32 %v1197_v28, %v2438_v30  ;;  %v1199_v3 = vpop.f32.mrb[87].mxu1 }
 0x286   :  { %v1883_v16 = vpack.c.bf16 %v1196_v27, %v1194_v25  ;;  %v1200_v17 = vadd.f32 %v1199_v3, %v2440_v31 }
 0x288   :  { %1656 = vst [vmem:[#allocation2 + $0x1e0] sm:$0xff] %v1883_v16  ;;  %v1884_v29 = vpack.c.bf16 %v1200_v17, %v1198_v51 }
 0x28a   :  { %1657 = vst [vmem:[#allocation2 + $0x1e8] sm:$0xff] %v1884_v29  ;;  %v1203_v32 = vpop.f32.mrb[88].mxu1 }
 0x28b   :  { %v1204_v33 = vadd.f32 %v1203_v32, %v2438_v30  ;;  %v1205_v34 = vpop.f32.mrb[89].mxu1 }
 0x28c   :  { %v1206_v35 = vadd.f32 %v1205_v34, %v2440_v31  ;;  %v1207_v36 = vpop.f32.mrb[90].mxu1 }
 0x28d   :  { %v1208_v44 = vadd.f32 %v1207_v36, %v2438_v30  ;;  %v1209_v37 = vpop.f32.mrb[91].mxu1 }
 0x28e   :  { %v1885_v38 = vpack.c.bf16 %v1206_v35, %v1204_v33  ;;  %v1210_v39 = vadd.f32 %v1209_v37, %v2440_v31 }
 0x290   :  { %1658 = vst [vmem:[#allocation2 + $0x1f0] sm:$0xff] %v1885_v38  ;;  %v1886_v40 = vpack.c.bf16 %v1210_v39, %v1208_v44 }
 0x292   :  { %1659 = vst [vmem:[#allocation2 + $0x1f8] sm:$0xff] %v1886_v40 }
 0x293   :  { %2078 = shalt.err (!%p2075_p4)
}
 0x294   :  { %s2079_s19 = scalar_lea.hbm %s2587_s5, 8192 }
 0x295   :  { %p2080_p5 = scmp.ne.s32.totalorder %s2587_s5, %s2079_s19  ;;  %p2083_p6 = scmp.lt.u32.totalorder %s2079_s19, %s2587_s5 }
 0x297   :  { %p2085_p7 = pnand %p2083_p6, %p2080_p5 }
 0x299   :  { %2088 = shalt.err (!%p2085_p7)
}
 0x29a   :  { %s2093_s24 = smov 128   ;;  %s2094_s25 = smov 8  }
 0x29b   :  { %1671 = dma.vmem_to_hbm [thread:$0]  %s1666_s15, 8192, %s2587_s5, [#allocation3], %s2093_s24, %s2093_s24, %s2094_s25  }
 0x29c   :  { %2089 = dma.done.wait [#allocation3], 8192  }
 0x29d   :  { %2090 = vsyncadd [#allocation3], 4294959104 }
 0x29e   :  { %1675 = vsyncpa [#allocation3], 1 }

</bundles_post_ra>
